<compile_context>
chip_gen: v7x
topology: tpu7x:2x2x1
jax: 0.10.0
libtpu: 0.0.40
codegen_flags: <defaults>
</compile_context>

<pallas_src>
import functools

import jax
import jax.numpy as jnp
from jax import lax
from jax.experimental import pallas as pl
from jax.experimental.pallas import tpu as pltpu


def _clip_pair_sums_kernel(scale_ref, img_ref, *args, slice_counts, hidden,
                           n_valid, row_tile, padded):
    """One grid step: a (row_tile,) tile of feature rows vs ALL image columns.

    Writes per-tile partial sums of exp(scale*logits - |scale|):
      rowsum_ref : (tn, K)      per feature row, summed over image columns
      colsum_ref : (1, K, N)    per image column, summed over this tile's rows
    No carried state -> the grid axis is fully parallel.
    """
    n_groups = len(slice_counts)
    feat_refs = args[:n_groups]
    rowsum_ref = args[n_groups]
    colsum_ref = args[n_groups + 1]

    h = hidden
    tn = row_tile
    n_cols = img_ref.shape[1]

    scale = scale_ref[0]
    shift = jnp.abs(scale)          # constant LSE shift (L2-normalized features)
    img = img_ref[...]              # (H, N), resident across the whole grid

    if padded:
        row0 = pl.multiple_of(pl.program_id(0) * tn, tn)
        row_ids = lax.broadcasted_iota(jnp.int32, (tn, 1), 0) + row0
        valid = row_ids < n_valid   # mask zero-padded feature rows

    row_sums = []
    col_sums = []
    for g in range(n_groups):
        feat_ref = feat_refs[g]
        for kk in range(slice_counts[g]):
            feat = feat_ref[:, kk * h:(kk + 1) * h]          # (tn, H) static slice
            # (tn, N) logits block: NN matmul in native dtype, f32 accumulate.
            blk = lax.dot_general(
                feat, img,
                dimension_numbers=(((1,), (0,)), ((), ())),
                preferred_element_type=jnp.float32)
            # Scale on the VPU after the MXU; one EUP exp per block.
            e = jnp.exp(blk * scale - shift)
            if padded:
                e = jnp.where(valid, e, 0.0)
            row_sums.append(jnp.sum(e, axis=1, keepdims=True))   # (tn, 1)
            col_sums.append(jnp.sum(e, axis=0, keepdims=True))   # (1, N)

    k_total = len(row_sums)
    # ONE dense store per output per grid step (no per-slice masked row stores).
    rowsum_ref[...] = jnp.concatenate(row_sums, axis=1)                       # (tn, K)
    colsum_ref[...] = jnp.concatenate(col_sums, axis=0).reshape(1, k_total, n_cols)


def _round_up(x, m):
    return ((x + m - 1) // m) * m


def _pick_row_tile(n, n_cols):
    """Largest MXU-friendly row tile whose (tn, N) f32 temporaries stay modest."""
    for t in (512, 256, 128):
        if n >= t and 3 * t * n_cols * 4 <= 12 * 1024 * 1024:
            return t
    if n >= 128:
        return 128
    return max(8, _round_up(n, 8))


def _vmem_limit_bytes(budget):
    """Per-chip VMEM limit: budget + headroom, capped at 80% of physical VMEM."""
    try:
        phys = int(pltpu.get_tpu_info().vmem_capacity_bytes)
    except Exception:                       # be conservative if the query fails
        phys = 64 * 1024 * 1024             # v7x physical
    cap = max(16 * 1024 * 1024, int(phys * 0.8))
    want = max(32 * 1024 * 1024, int(budget * 1.5))
    return min(want, cap)


def _clip_pair_loss_sum(image_nh, feature_groups, logit_scale, row_tile=None):
    """Sum over all slices in `feature_groups` (list of (N, K_i, H) arrays) of
    0.5*(CE(scale*img@f.T) + CE(scale*f@img.T)), as one pallas_call + tiny epilogue."""
    n, h = image_nh.shape
    slice_counts = tuple(int(f.shape[1]) for f in feature_groups)
    k_total = sum(slice_counts)

    if row_tile is not None:
        tn = max(8, _round_up(int(row_tile), 8))
    else:
        tn = _pick_row_tile(n, n)
    n_pad = _round_up(max(n, tn), tn)
    grid_j = n_pad // tn
    padded = n_pad != n

    scale = jnp.asarray(logit_scale, dtype=jnp.float32)
    scale_arr = jnp.reshape(scale, (1,))
    shift = jnp.abs(scale)

    # Image stored (H, N): plain NN matmul orientation inside the kernel.
    img_hn = jnp.transpose(image_nh)
    # Features keep native layout modulo a free (N,K,H)->(N,K*H) reshape
    # (+ zero-pad of the row axis when N is not a tile multiple).
    feats_2d = []
    for f, c in zip(feature_groups, slice_counts):
        f2 = f.reshape(n, c * h)
        if padded:
            f2 = jnp.pad(f2, ((0, n_pad - n), (0, 0)))
        feats_2d.append(f2)

    itemsize = jnp.dtype(image_nh.dtype).itemsize
    budget = (h * n * itemsize                              # resident image
              + 2 * tn * k_total * h * itemsize             # double-buffered feature tiles
              + 2 * (tn * k_total + k_total * n) * 4        # output blocks
              + 3 * tn * n * 4)                             # live f32 logits/exp temporaries
    cost = pl.CostEstimate(
        flops=int(2 * k_total * n_pad * n * h + 6 * k_total * n_pad * n),
        transcendentals=int(k_total * n_pad * n),
        bytes_accessed=int((n * h + k_total * n_pad * h) * itemsize
                           + (n_pad * k_total + grid_j * k_total * n) * 4 + 4),
    )

    kernel = functools.partial(_clip_pair_sums_kernel, slice_counts=slice_counts,
                               hidden=h, n_valid=n, row_tile=tn, padded=padded)

    rowsum, colsum_part = pl.pallas_call(
        kernel,
        out_shape=(jax.ShapeDtypeStruct((n_pad, k_total), jnp.float32),
                   jax.ShapeDtypeStruct((grid_j, k_total, n), jnp.float32)),
        grid_spec=pltpu.PrefetchScalarGridSpec(
            num_scalar_prefetch=1,
            grid=(grid_j,),
            in_specs=[pl.BlockSpec((h, n), lambda j, s: (0, 0))] +     # image, resident
                     [pl.BlockSpec((tn, c * h), lambda j, s: (j, 0))   # streamed slices
                      for c in slice_counts],
            out_specs=(pl.BlockSpec((tn, k_total), lambda j, s: (j, 0)),
                       pl.BlockSpec((1, k_total, n), lambda j, s: (j, 0, 0)))),
        compiler_params=pltpu.CompilerParams(
            dimension_semantics=("parallel",),     # no carried state -> megacore ok
            vmem_limit_bytes=_vmem_limit_bytes(budget)),
        cost_estimate=cost,
    )(scale_arr, img_hn, *feats_2d)

    # O(K*N) epilogue in plain JAX (negligible vs the N^2*K*H matmuls).
    colsum = jnp.sum(colsum_part, axis=0)                   # (K, N) image->text sums
    lse_row = shift + jnp.log(rowsum[:n, :])                 # (N, K) text->image LSE
    lse_col = shift + jnp.log(colsum)                        # (K, N) image->text LSE
    diag = jnp.concatenate(
        [jnp.einsum('nh,nkh->nk', image_nh.astype(jnp.float32),
                    f.astype(jnp.float32)) for f in feature_groups],
        axis=1) * scale                                      # (N, K) shared diagonal
    return 0.5 * (jnp.sum(lse_row) + jnp.sum(lse_col) - 2.0 * jnp.sum(diag)) / n


def clip_loss_forward(image_features, text_features, deg_img, logit_scale,
                      de_region=None, row_tile=None):
    """ClipLoss.forward for world_size == 1.  Returns (total_loss, de_region_loss)."""
    de_region_loss = jnp.float32(0.0)
    if de_region is not None and len(de_region) > 0:
        target_region = jnp.squeeze(de_region[0], axis=1)    # (N, H)
        deg_rg = jnp.squeeze(de_region[1], axis=1)           # (N, H)
        # TODO(synk): fuse pos_loss / neg_score into one pallas_call (shared
        # degradation stream, two resident query images).
        pos_loss = _clip_pair_loss_sum(target_region, [deg_img], logit_scale, row_tile)
        neg_score = _clip_pair_loss_sum(deg_rg, [deg_img], logit_scale, row_tile)
        de_region_loss = pos_loss / neg_score

    # Text slices then degradation slices, exactly like the two PyTorch loops.
    total = _clip_pair_loss_sum(image_features, [text_features, deg_img],
                                logit_scale, row_tile)
    total_loss = total / (text_features.shape[1] + deg_img.shape[1])
    return total_loss, de_region_loss


# ----------------------------- pure-JAX reference ---------------------------

def _ce(logits):
    n = logits.shape[0]
    idx = jnp.arange(n)
    lse = jax.nn.logsumexp(logits.astype(jnp.float32), axis=1)
    return jnp.mean(lse - logits[idx, idx].astype(jnp.float32))


def _reference_pair_sum(img, feats_nkh, scale):
    tot = jnp.float32(0.0)
    for k in range(feats_nkh.shape[1]):
        f = feats_nkh[:, k, :]
        tot += 0.5 * (_ce(scale * img @ f.T) + _ce(scale * f @ img.T))
    return tot


def _reference_clip_loss(image_features, text_features, deg_img, logit_scale,
                         de_region=None):
    feats = jnp.concatenate([text_features, deg_img], axis=1)
    total = _reference_pair_sum(image_features, feats, logit_scale) / feats.shape[1]
    de_loss = jnp.float32(0.0)
    if de_region is not None:
        tr = jnp.squeeze(de_region[0], axis=1)
        dr = jnp.squeeze(de_region[1], axis=1)
        pos = _reference_pair_sum(tr, deg_img, logit_scale)
        neg = _reference_pair_sum(dr, deg_img, logit_scale)
        de_loss = pos / neg
    return total, de_loss


if __name__ == "__main__":
    key = jax.random.PRNGKey(0)
    k1, k2, k3, k4, k5 = jax.random.split(key, 5)

    N, H, T, D = 8, 32, 2, 3    # batch, hidden, text slices, degradation slices

    def _norm(x):
        return x / jnp.linalg.norm(x, axis=-1, keepdims=True)

    image_features = _norm(jax.random.normal(k1, (N, H), dtype=jnp.float32))
    text_features = _norm(jax.random.normal(k2, (N, T, H), dtype=jnp.float32))
    deg_img = _norm(jax.random.normal(k3, (N, D, H), dtype=jnp.float32))
    de_region = [_norm(jax.random.normal(k4, (N, 1, H), dtype=jnp.float32)),
                 _norm(jax.random.normal(k5, (N, 1, H), dtype=jnp.float32))]
    logit_scale = jnp.float32(14.285714)  # ~ exp(log(1/0.07))

    total_loss, de_loss = clip_loss_forward(
        image_features, text_features, deg_img, logit_scale, de_region=de_region)
    total_loss = jax.block_until_ready(total_loss)
    de_loss = jax.block_until_ready(de_loss)

    ref_total, ref_de = _reference_clip_loss(
        image_features, text_features, deg_img, logit_scale, de_region=de_region)
    assert jnp.allclose(total_loss, ref_total, rtol=1e-5, atol=1e-5), (total_loss, ref_total)
    assert jnp.allclose(de_loss, ref_de, rtol=1e-5, atol=1e-5), (de_loss, ref_de)

    # Multi-row-tile (grid_j > 1) streaming path.
    N2 = 32
    img2 = _norm(jax.random.normal(jax.random.PRNGKey(1), (N2, H), dtype=jnp.float32))
    txt2 = _norm(jax.random.normal(jax.random.PRNGKey(2), (N2, T, H), dtype=jnp.float32))
    deg2 = _norm(jax.random.normal(jax.random.PRNGKey(3), (N2, D, H), dtype=jnp.float32))
    total2, _ = clip_loss_forward(img2, txt2, deg2, logit_scale,
                                  de_region=None, row_tile=8)
    total2 = jax.block_until_ready(total2)
    ref2, _ = _reference_clip_loss(img2, txt2, deg2, logit_scale)
    assert jnp.allclose(total2, ref2, rtol=1e-5, atol=1e-5), (total2, ref2)

    # Non-tile-multiple N: exercises the row-padding + in-kernel mask path.
    N3, T3, D3 = 20, 1, 2
    img3 = _norm(jax.random.normal(jax.random.PRNGKey(4), (N3, H), dtype=jnp.float32))
    txt3 = _norm(jax.random.normal(jax.random.PRNGKey(5), (N3, T3, H), dtype=jnp.float32))
    deg3 = _norm(jax.random.normal(jax.random.PRNGKey(6), (N3, D3, H), dtype=jnp.float32))
    total3, _ = clip_loss_forward(img3, txt3, deg3, logit_scale,
                                  de_region=None, row_tile=8)
    total3 = jax.block_until_ready(total3)
    ref3, _ = _reference_clip_loss(img3, txt3, deg3, logit_scale)
    assert jnp.allclose(total3, ref3, rtol=1e-5, atol=1e-5), (total3, ref3)

    print("KERNEL_OK")
</pallas_src>

<mosaic_0001>
module attributes {stable_mosaic.version = 11 : i64} {
  func.func @_clip_pair_sums_kernel(%arg0: i32, %arg1: memref<1xf32, #tpu.memory_space<smem>>, %arg2: memref<32x8xf32, #tpu.memory_space<vmem>>, %arg3: memref<8x96xf32, #tpu.memory_space<vmem>>, %arg4: memref<8x3xf32, #tpu.memory_space<vmem>>, %arg5: memref<1x3x8xf32, #tpu.memory_space<vmem>>) attributes {dimension_semantics = [#tpu.dimension_semantics<parallel>], iteration_bounds = array<i64: 1>, scalar_prefetch = 1 : i64, scratch_operands = 0 : i64, tpu.core_type = #tpu.core_type<tc>, window_params = [{pipeline_mode = #tpu.pipeline_mode<synchronous>, transform_indices = @transform_0, window_bounds = array<i64: 32, 8>}, {transform_indices = @transform_1, window_bounds = array<i64: 8, 96>}, {transform_indices = @transform_2, window_bounds = array<i64: 8, 3>}, {transform_indices = @transform_3, window_bounds = array<i64: 1, 3, 8>}]} {
    %c0 = arith.constant 0 : index
    %0 = memref.load %arg1[%c0] : memref<1xf32, #tpu.memory_space<smem>>
    %1 = math.absf %0 : f32
    %c0_0 = arith.constant 0 : index
    %c0_1 = arith.constant 0 : index
    %2 = vector.load %arg2[%c0_0, %c0_1] : memref<32x8xf32, #tpu.memory_space<vmem>>, vector<32x8xf32>
    %c0_2 = arith.constant 0 : index
    %c0_3 = arith.constant 0 : index
    %3 = vector.load %arg3[%c0_2, %c0_3] : memref<8x96xf32, #tpu.memory_space<vmem>>, vector<8x32xf32>
    %cst = arith.constant dense<0.000000e+00> : vector<8x8xf32>
    %4 = tpu.matmul %3, %2, %cst {dimension_numbers = #tpu.dot_dimension_numbers<[1], [0], [0], [1], [0, 0, 1, 1], [], []>} : vector<8x32xf32>, vector<32x8xf32>, vector<8x8xf32> -> vector<8x8xf32>
    %5 = vector.broadcast %0 : f32 to vector<8x8xf32>
    %6 = arith.mulf %4, %5 : vector<8x8xf32>
    %7 = vector.broadcast %1 : f32 to vector<8x8xf32>
    %8 = arith.subf %6, %7 : vector<8x8xf32>
    %9 = math.exp %8 : vector<8x8xf32>
    %cst_4 = arith.constant dense<0.000000e+00> : vector<8xf32>
    %10 = vector.multi_reduction <add>, %9, %cst_4 [1] : vector<8x8xf32> to vector<8xf32>
    %11 = vector.shape_cast %10 : vector<8xf32> to vector<8x1xf32>
    %cst_5 = arith.constant dense<0.000000e+00> : vector<8xf32>
    %12 = vector.multi_reduction <add>, %9, %cst_5 [0] : vector<8x8xf32> to vector<8xf32>
    %13 = vector.shape_cast %12 : vector<8xf32> to vector<1x8xf32>
    %c0_6 = arith.constant 0 : index
    %c32 = arith.constant 32 : index
    %14 = vector.load %arg3[%c0_6, %c32] : memref<8x96xf32, #tpu.memory_space<vmem>>, vector<8x32xf32>
    %cst_7 = arith.constant dense<0.000000e+00> : vector<8x8xf32>
    %15 = tpu.matmul %14, %2, %cst_7 {dimension_numbers = #tpu.dot_dimension_numbers<[1], [0], [0], [1], [0, 0, 1, 1], [], []>} : vector<8x32xf32>, vector<32x8xf32>, vector<8x8xf32> -> vector<8x8xf32>
    %16 = vector.broadcast %0 : f32 to vector<8x8xf32>
    %17 = arith.mulf %15, %16 : vector<8x8xf32>
    %18 = vector.broadcast %1 : f32 to vector<8x8xf32>
    %19 = arith.subf %17, %18 : vector<8x8xf32>
    %20 = math.exp %19 : vector<8x8xf32>
    %cst_8 = arith.constant dense<0.000000e+00> : vector<8xf32>
    %21 = vector.multi_reduction <add>, %20, %cst_8 [1] : vector<8x8xf32> to vector<8xf32>
    %22 = vector.shape_cast %21 : vector<8xf32> to vector<8x1xf32>
    %cst_9 = arith.constant dense<0.000000e+00> : vector<8xf32>
    %23 = vector.multi_reduction <add>, %20, %cst_9 [0] : vector<8x8xf32> to vector<8xf32>
    %24 = vector.shape_cast %23 : vector<8xf32> to vector<1x8xf32>
    %c0_10 = arith.constant 0 : index
    %c64 = arith.constant 64 : index
    %25 = vector.load %arg3[%c0_10, %c64] : memref<8x96xf32, #tpu.memory_space<vmem>>, vector<8x32xf32>
    %cst_11 = arith.constant dense<0.000000e+00> : vector<8x8xf32>
    %26 = tpu.matmul %25, %2, %cst_11 {dimension_numbers = #tpu.dot_dimension_numbers<[1], [0], [0], [1], [0, 0, 1, 1], [], []>} : vector<8x32xf32>, vector<32x8xf32>, vector<8x8xf32> -> vector<8x8xf32>
    %27 = vector.broadcast %0 : f32 to vector<8x8xf32>
    %28 = arith.mulf %26, %27 : vector<8x8xf32>
    %29 = vector.broadcast %1 : f32 to vector<8x8xf32>
    %30 = arith.subf %28, %29 : vector<8x8xf32>
    %31 = math.exp %30 : vector<8x8xf32>
    %cst_12 = arith.constant dense<0.000000e+00> : vector<8xf32>
    %32 = vector.multi_reduction <add>, %31, %cst_12 [1] : vector<8x8xf32> to vector<8xf32>
    %33 = vector.shape_cast %32 : vector<8xf32> to vector<8x1xf32>
    %cst_13 = arith.constant dense<0.000000e+00> : vector<8xf32>
    %34 = vector.multi_reduction <add>, %31, %cst_13 [0] : vector<8x8xf32> to vector<8xf32>
    %35 = vector.shape_cast %34 : vector<8xf32> to vector<1x8xf32>
    %36 = tpu.concatenate %11, %22, %33 in 1 : vector<8x1xf32>, vector<8x1xf32>, vector<8x1xf32> -> vector<8x3xf32>
    %c0_14 = arith.constant 0 : index
    %c0_15 = arith.constant 0 : index
    %37 = vector.load %arg4[%c0_14, %c0_15] : memref<8x3xf32, #tpu.memory_space<vmem>>, vector<8x3xf32>
    tpu.vector_store %arg4[%c0_14, %c0_15], %36 {strides = array<i32>} : memref<8x3xf32, #tpu.memory_space<vmem>>, vector<8x3xf32>,
    %38 = tpu.concatenate %13, %24, %35 in 0 : vector<1x8xf32>, vector<1x8xf32>, vector<1x8xf32> -> vector<3x8xf32>
    %39 = vector.shape_cast %38 : vector<3x8xf32> to vector<1x3x8xf32>
    %c0_16 = arith.constant 0 : index
    %c0_17 = arith.constant 0 : index
    %c0_18 = arith.constant 0 : index
    %40 = vector.load %arg5[%c0_16, %c0_17, %c0_18] : memref<1x3x8xf32, #tpu.memory_space<vmem>>, vector<1x3x8xf32>
    tpu.vector_store %arg5[%c0_16, %c0_17, %c0_18], %39 {strides = array<i32>} : memref<1x3x8xf32, #tpu.memory_space<vmem>>, vector<1x3x8xf32>,
    return
  }
  func.func @transform_0(%arg0: i32, %arg1: memref<1xf32, #tpu.memory_space<smem>>) -> (i32, i32) {
    %c0_i32 = arith.constant 0 : i32
    %c0_i32_0 = arith.constant 0 : i32
    %c0_i32_1 = arith.constant 0 : i32
    return %c0_i32, %c0_i32_0 : i32, i32
  }
  func.func @transform_1(%arg0: i32, %arg1: memref<1xf32, #tpu.memory_space<smem>>) -> (i32, i32) {
    %c0_i32 = arith.constant 0 : i32
    %c0_i32_0 = arith.constant 0 : i32
    return %arg0, %c0_i32 : i32, i32
  }
  func.func @transform_2(%arg0: i32, %arg1: memref<1xf32, #tpu.memory_space<smem>>) -> (i32, i32) {
    %c0_i32 = arith.constant 0 : i32
    %c0_i32_0 = arith.constant 0 : i32
    return %arg0, %c0_i32 : i32, i32
  }
  func.func @transform_3(%arg0: i32, %arg1: memref<1xf32, #tpu.memory_space<smem>>) -> (i32, i32, i32) {
    %c0_i32 = arith.constant 0 : i32
    %c0_i32_0 = arith.constant 0 : i32
    %c0_i32_1 = arith.constant 0 : i32
    return %arg0, %c0_i32, %c0_i32_0 : i32, i32, i32
  }
}

</mosaic_0001>

<bundles_post_ra>
// kernel: tpu_custom_call.1
= control target key start
LH: loop header
LB: loop body
LE: loop exit
PB: predicated region body
PF: predicated region fallthrough
CT: control target
= control target key end

     0   :  { %v386_v1 = vmov 0.0|0.0   ;;  %vm387_vm0 = vmmov 0   ;;  %v388_v4 = vmov 0.0   ;;  %s389_s21 = smov 96   ;;  %s390_s25 = smov 64   ;;  %vm22_vm1 = vcmask 261120   ;;  %s449_s2 = inlined_call_operand.vmem [shape: f32[8,96], index: 2, kind: input, shape index: {}]   ;;  %s450_s1 = inlined_call_operand.vmem [shape: f32[32,8], index: 1, kind: input, shape index: {}]   ;;  %s451_s0 = inlined_call_operand.<no memory space> [shape: f32[1], index: 0, kind: input, shape index: {}]   ;;  %s452_s4 = inlined_call_operand.vmem [shape: f32[1,3,8], index: 4, kind: output, shape index: {1}]   ;;  %s453_s3 = inlined_call_operand.vmem [shape: f32[8,3], index: 3, kind: output, shape index: {0}]  }
   0x1   :  { %v21_v0 = vld [vmem:[%s449_s2] sm:$0xff]  ;;  %357 = vmatprep.subr.bf16.mxu0 %v386_v1  ;;  %v18_v3 = vld [vmem:[%s450_s1 + $0x8] sm:$0xff]  ;;  %332 = vmatprep.mubr.msk.f32.mxu0 %vm387_vm0, %v388_v4  ;;  %v19_v6 = vld [vmem:[%s450_s1 + $0x10] sm:$0xff]  ;;  %s16_s27 = sand.u32 2147483647, %s451_s0  ;;  %v96_v11 = vstv %s451_s0  ;;  %vm102_vm2 = vcmask 64512  }
   0x2   :  { %v17_v2 = vld [vmem:[%s450_s1] sm:$0xff]  ;;  %112 = vrot.lane.b32.xlu0 %v21_v0, %s389_s21  ;;  %v20_v7 = vld [vmem:[%s450_s1 + $0x18] sm:$0xff]  ;;  %363 = vmatprep.subr.bf16.mxu1 %v386_v1  ;;  %v98_v13 = vstv %s16_s27  ;;  %vm292_vm3 = vcmask 1040384   ;;  %vm294_vm4 = vcmask 1041408   ;;  %vm296_vm5 = vcmask 59392  }
   0x3   :  { %v358_v5 = vpack.c.bf16 %v18_v3, %v17_v2  ;;  %343 = vmatprep.mubr.msk.f32.mxu1 %vm387_vm0, %v388_v4  ;;  %v361_v8 = vpack.c.bf16 %v20_v7, %v19_v6  ;;  %vm286_vm6 = vcmask 7168   ;;  %vm288_vm7 = vcmask 15360  }
   0x4   :  { %vm290_vm8 = vcmask 23552  }
   0x5   :  { %359 = vmatpush3.bf16.msra.mxu0 %v358_v5  ;;  %365 = vmatpush3.bf16.msra.mxu1 %v358_v5 }
   0x6   :  { %360 = vmatprep.subr.bf16.mxu0 %v386_v1  ;;  %366 = vmatprep.subr.bf16.mxu1 %v386_v1 }
   0x7   :  { %199 = vrot.lane.b32.xlu0 %v21_v0, %s390_s25 }
   0x9   :  { %362 = vmatpush3.bf16.msra.mxu0 %v361_v8  ;;  %368 = vmatpush3.bf16.msra.mxu1 %v361_v8 }
   0xa   :  { %369 = vmatprep.subr.bf16.mxu0 %v386_v1 }
   0xc   :  { %333 = vmatmul.mubr.msk.f32.vlgmr.msra.gmra.mrb[0].mxu0 %vm22_vm1, %v21_v0 }
   0xd   :  { %371 = vmatpush3.bf16.msra.mxu0 %v358_v5  ;;  %354 = vmatprep.mubr.msk.f32.mxu0 %vm387_vm0, %v388_v4 }
   0xe   :  { %372 = vmatprep.subr.bf16.mxu0 %v386_v1 }
  0x11   :  { %374 = vmatpush3.bf16.msra.mxu0 %v361_v8 }
  0x74   :  { %v113_v9 = vpop.permute.xlu0 %112 }
  0x75   :  { %344 = vmatmul.mubr.msk.f32.vlgmr.msra.gmra.mrb[0].mxu1 %vm22_vm1, %v113_v9 }
  0x79   :  { %v200_v10 = vpop.permute.xlu0 %199 }
  0x7a   :  { %355 = vmatmul.mubr.msk.f32.vlgmr.msra.gmra.mrb[2].mxu0 %vm22_vm1, %v200_v10 }
  0xdf   :  { %v92_v12 = vpop.f32.mrb[0].mxu0 }
  0xe0   :  { %v97_v14 = vmul.f32 %v96_v11, %v92_v12  ;;  %v334_v15 = vpop.f32.mrb[1].mxu0 }
  0xe2   :  { %v99_v16 = vsub.f32 %v97_v14, %v98_v13 }
  0xe4   :  { %v100_v17 = vmul.f32 1.442695, %v99_v16 }
  0xe6   :  { %380 = vpow2.f32 %v100_v17 }
  0xf0   :  { %v381_v18 = vpop.eup %380 }
  0xf1   :  { %v103_v19 = vsel %vm102_vm2, %v381_v18, 0.0 }
  0xf2   :  { %104 = vadd.xlane.f32.xlu1 %v103_v19  ;;  %v106_v30 = vrot.slane %v103_v19, 4 }
  0xf4   :  { %v107_v31 = vadd.f32 %v106_v30, %v103_v19 }
  0xf6   :  { %v108_v33 = vrot.slane %v107_v31, 2 }
  0xf8   :  { %v109_v37 = vadd.f32 %v108_v33, %v107_v31 }
  0xfa   :  { %v110_v42 = vrot.slane %v109_v37, 1 }
  0xfc   :  { %v111_v47 = vadd.f32 %v110_v42, %v109_v37 }
 0x148   :  { %v182_v20 = vpop.f32.mrb[0].mxu1 }
 0x149   :  { %v186_v21 = vmul.f32 %v182_v20, %v96_v11  ;;  %v345_v22 = vpop.f32.mrb[1].mxu1 }
 0x14b   :  { %v187_v23 = vsub.f32 %v186_v21, %v98_v13 }
 0x14d   :  { %v269_v24 = vpop.f32.mrb[2].mxu0  ;;  %v188_v25 = vmul.f32 1.442695, %v187_v23 }
 0x14e   :  { %v273_v26 = vmul.f32 %v269_v24, %v96_v11  ;;  %v356_v27 = vpop.f32.mrb[3].mxu0 }
 0x14f   :  { %382 = vpow2.f32 %v188_v25 }
 0x150   :  { %v274_v28 = vsub.f32 %v273_v26, %v98_v13 }
 0x152   :  { %v275_v29 = vmul.f32 1.442695, %v274_v28 }
 0x154   :  { %384 = vpow2.f32 %v275_v29 }
 0x159   :  { %v383_v32 = vpop.eup %382 }
 0x15a   :  { %v190_v34 = vsel %vm102_vm2, %v383_v32, 0.0 }
 0x15b   :  { %v193_v35 = vrot.slane %v190_v34, 4  ;;  %191 = vadd.xlane.f32.xlu1 %v190_v34 }
 0x15d   :  { %v194_v38 = vadd.f32 %v193_v35, %v190_v34 }
 0x15e   :  { %v385_v36 = vpop.eup %384 }
 0x15f   :  { %v277_v39 = vsel %vm102_vm2, %v385_v36, 0.0  ;;  %v195_v40 = vrot.slane %v194_v38, 2 }
 0x160   :  { %278 = vadd.xlane.f32.xlu0 %v277_v39  ;;  %v280_v41 = vrot.slane %v277_v39, 4 }
 0x161   :  { %v196_v43 = vadd.f32 %v195_v40, %v194_v38 }
 0x162   :  { %v281_v44 = vadd.f32 %v280_v41, %v277_v39 }
 0x163   :  { %v197_v45 = vrot.slane %v196_v43, 1 }
 0x164   :  { %v282_v46 = vrot.slane %v281_v44, 2 }
 0x165   :  { %v198_v48 = vadd.f32 %v197_v45, %v196_v43 }
 0x166   :  { %v283_v49 = vadd.f32 %v282_v46, %v281_v44 }
 0x167   :  { %v293_v50 = vsel %vm292_vm3, %v111_v47, %v198_v48 }
 0x168   :  { %v284_v51 = vrot.slane %v283_v49, 1 }
 0x16a   :  { %v285_v52 = vadd.f32 %v284_v51, %v283_v49 }
 0x16c   :  { %v295_v53 = vsel %vm294_vm4, %v293_v50, %v285_v52 }
 0x16d   :  { %297 = vst.msk [vmem:[%s452_s4] sm:$0x7] %vm296_vm5, %v295_v53 }
 0x17f   :  { %v105_v54 = vpop.xlane.xlu1 %104 }
 0x1e8   :  { %v192_v55 = vpop.xlane.xlu1 %191 }
 0x1e9   :  { %v287_v56 = vsel %vm286_vm6, %v105_v54, %v192_v55 }
 0x1ed   :  { %v279_v57 = vpop.xlane.xlu0 %278 }
 0x1ee   :  { %v289_v58 = vsel %vm288_vm7, %v287_v56, %v279_v57 }
 0x1ef   :  { %291 = vst.msk [vmem:[%s453_s3] sm:$0xff] %vm290_vm8, %v289_v58 }

</bundles_post_ra>
